<compile_context>
chip_gen: v5e
topology: v5e:2x2
jax: 0.10.0
libtpu: 0.0.40
codegen_flags: <defaults>
</compile_context>

<pallas_src>
import math
import functools

import jax
import jax.numpy as jnp
import numpy as np
from jax.experimental import pallas as pl
from jax.experimental.pallas import tpu as pltpu


def _round_up(n, m=8):
    return ((n + m - 1) // m) * m


def set_transformer_kernel(params_ref, x_ref, out_ref, *,
                           HL, S, E, O,
                           r_A, r_mask, r_wv, r_bv, r_ones, r_wcomb, r_bcomb):
    # ---- host-folded constants; every slice starts at sublane offset %8==0 and lane 0 ----
    A      = params_ref[r_A:r_A + HL, 0:E]          # (HL, E)  (q_stacked/sqrt(Dh)) @ W_k
    mask   = params_ref[r_mask:r_mask + HL, 0:E]    # (HL, E)  head-selection mask
    wv     = params_ref[r_wv:r_wv + E, 0:E]         # (E, E)   W_v^T (pre-transposed)
    bv     = params_ref[r_bv:r_bv + 1, 0:E]         # (1, E)
    ones_r = params_ref[r_ones:r_ones + 1, 0:HL]    # (1, HL)  pooling row (1/L lives in w_comb)
    w_comb = params_ref[r_wcomb:r_wcomb + E, 0:O]   # (E, O)   out_proj . mean . fc_out folded
    b_comb = params_ref[r_bcomb:r_bcomb + 1, 0:O]   # (1, O)

    x = x_ref[0]                                    # (S, E) current set

    # scores[(h,l), s] = <q_h[l], k_h[s]> / sqrt(Dh).  The K bias adds a per-row constant and is
    # softmax-invariant, so it is dropped.  Contraction over both last dims -> no k transpose.
    scores = jax.lax.dot_general(
        A, x, dimension_numbers=(((1,), (1,)), ((), ())),
        preferred_element_type=jnp.float32)         # (HL, S)

    # Plain row softmax (each row is exactly one (head, query) pair).
    m = jnp.max(scores, axis=-1, keepdims=True)
    p = jnp.exp(scores - m)
    denom = jnp.sum(p, axis=-1, keepdims=True)
    # approx=True would move this to the EUP but breaks 1e-5 agreement with the f32 reference.
    p = p * pl.reciprocal(denom, approx=False)

    # V projection + one PV matmul for all heads.
    v = jnp.dot(x, wv, preferred_element_type=jnp.float32) + bv        # (S, E)
    ctx = jnp.dot(p, v, preferred_element_type=jnp.float32)            # (HL, E)

    # head concat + mean-pool as ONE MXU matmul (no sublane/XLU reduction); 1/L is in w_comb.
    pooled = jnp.dot(ones_r, ctx * mask, preferred_element_type=jnp.float32)          # (1, E)
    out_ref[0] = jnp.dot(pooled, w_comb, preferred_element_type=jnp.float32) + b_comb  # (1, O)


def prepare_params(inducing_points, in_proj_weight, in_proj_bias,
                   out_proj_weight, out_proj_bias, fc_weight, fc_bias, *, num_heads):
    """One-time host-side folding + packing (outside the per-call hot path)."""
    inducing_points = np.asarray(inducing_points, np.float32)
    in_proj_weight = np.asarray(in_proj_weight, np.float32)
    in_proj_bias = np.asarray(in_proj_bias, np.float32)
    out_proj_weight = np.asarray(out_proj_weight, np.float32)
    out_proj_bias = np.asarray(out_proj_bias, np.float32)
    fc_weight = np.asarray(fc_weight, np.float32)
    fc_bias = np.asarray(fc_bias, np.float32)

    L, E = inducing_points.shape
    O = fc_weight.shape[0]
    H = num_heads
    assert E % H == 0
    Dh = E // H
    HL = H * L

    Wq, Wk, Wv = in_proj_weight[:E], in_proj_weight[E:2 * E], in_proj_weight[2 * E:]
    bq, bv = in_proj_bias[:E], in_proj_bias[2 * E:]
    # b_k intentionally dropped: per-(head, query) constant score shift, softmax-invariant.

    # Query path is input-independent -> fully precomputed, replicated head-major and masked.
    q = inducing_points @ Wq.T + bq                                    # (L, E)
    row_head = np.arange(HL)[:, None] // L
    col_head = np.arange(E)[None, :] // Dh
    head_mask = (row_head == col_head).astype(np.float32)              # (HL, E)
    q_stk = np.tile(q, (H, 1)) * head_mask / math.sqrt(Dh)             # (HL, E)
    A = q_stk @ Wk                                                     # (HL, E): scores = A @ x^T

    # out_proj -> mean-pool (1/L) -> fc_out collapsed into one affine map.
    w_comb = (out_proj_weight.T @ fc_weight.T) / float(L)              # (E, O)
    b_comb = out_proj_bias @ fc_weight.T + fc_bias                     # (O,)

    r_A = 0
    r_mask = _round_up(r_A + HL)
    r_wv = _round_up(r_mask + HL)
    r_bv = _round_up(r_wv + E)
    r_ones = _round_up(r_bv + 1)
    r_wcomb = _round_up(r_ones + 1)
    r_bcomb = _round_up(r_wcomb + E)
    rows = _round_up(r_bcomb + 1)
    cols = max(E, HL, O)

    blob = np.zeros((rows, cols), np.float32)
    blob[r_A:r_A + HL, 0:E] = A
    blob[r_mask:r_mask + HL, 0:E] = head_mask
    blob[r_wv:r_wv + E, 0:E] = Wv.T
    blob[r_bv, 0:E] = bv
    blob[r_ones, 0:HL] = 1.0
    blob[r_wcomb:r_wcomb + E, 0:O] = w_comb
    blob[r_bcomb, 0:O] = b_comb

    layout = dict(HL=HL, E=E, O=O, r_A=r_A, r_mask=r_mask, r_wv=r_wv, r_bv=r_bv,
                  r_ones=r_ones, r_wcomb=r_wcomb, r_bcomb=r_bcomb)
    return jnp.asarray(blob), layout


def set_transformer_forward_batched(xb, params_blob, *, layout):
    """xb: (B, S, E) -> (B, O); one grid step per set, parallel across TensorCores."""
    B, S, E = xb.shape
    assert E == layout["E"]
    HL, O = layout["HL"], layout["O"]
    rows, cols = params_blob.shape

    kernel = functools.partial(set_transformer_kernel, S=S, **layout)

    flops = 2 * B * (HL * E * S + S * E * E + HL * S * E + HL * E + E * O)
    cost = pl.CostEstimate(flops=flops,
                           transcendentals=B * HL * S,
                           bytes_accessed=4 * (rows * cols + B * S * E + B * O))

    out = pl.pallas_call(
        kernel,
        out_shape=jax.ShapeDtypeStruct((B, 1, O), jnp.float32),
        grid=(B,),
        in_specs=[pl.BlockSpec((rows, cols), lambda b: (0, 0)),   # params: resident, fetched once
                  pl.BlockSpec((1, S, E), lambda b: (b, 0, 0))],  # one set per step
        out_specs=pl.BlockSpec((1, 1, O), lambda b: (b, 0, 0)),
        compiler_params=pltpu.CompilerParams(dimension_semantics=("parallel",)),
        cost_estimate=cost,
    )(params_blob, xb)
    return out[:, 0, :]                                           # (B, O)


def set_transformer_forward(x, params_blob, *, layout):
    """Module-equivalent (unbatched) forward: x (S, E) -> (O,)."""
    return set_transformer_forward_batched(x[None], params_blob, layout=layout)[0]


def reference_forward(x, inducing_points,
                      in_proj_weight, in_proj_bias,
                      out_proj_weight, out_proj_bias,
                      fc_weight, fc_bias,
                      *, num_heads):
    """Plain-JAX reference mirroring torch.nn.MultiheadAttention (unbatched path)."""
    S, E = x.shape
    L = inducing_points.shape[0]
    head_dim = E // num_heads
    q = inducing_points @ in_proj_weight[:E].T + in_proj_bias[:E]
    k = x @ in_proj_weight[E:2 * E].T + in_proj_bias[E:2 * E]
    v = x @ in_proj_weight[2 * E:].T + in_proj_bias[2 * E:]
    qh = q.reshape(L, num_heads, head_dim).transpose(1, 0, 2)
    kh = k.reshape(S, num_heads, head_dim).transpose(1, 0, 2)
    vh = v.reshape(S, num_heads, head_dim).transpose(1, 0, 2)
    s = jnp.einsum('hld,hsd->hls', qh, kh) / math.sqrt(head_dim)
    p = jax.nn.softmax(s, axis=-1)
    o = jnp.einsum('hls,hsd->hld', p, vh).transpose(1, 0, 2).reshape(L, E)
    o = o @ out_proj_weight.T + out_proj_bias
    pooled = o.mean(axis=0)
    return pooled @ fc_weight.T + fc_bias


if __name__ == "__main__":
    # input_dim E=32, output_dim O=8, num_heads=4, num_inducing_points L=8, set size S=16, B=4 sets
    E, O, H, L, S, B = 32, 8, 4, 8, 16, 4

    keys = jax.random.split(jax.random.PRNGKey(0), 8)
    xb = jax.random.normal(keys[0], (B, S, E), jnp.float32)

    # Deterministic synthetic parameters (shapes match nn.MultiheadAttention / nn.Linear).
    inducing_points = jax.random.normal(keys[1], (L, E), jnp.float32)
    in_proj_weight = jax.random.normal(keys[2], (3 * E, E), jnp.float32) * 0.1
    in_proj_bias = jax.random.normal(keys[3], (3 * E,), jnp.float32) * 0.1
    out_proj_weight = jax.random.normal(keys[4], (E, E), jnp.float32) * 0.1
    out_proj_bias = jax.random.normal(keys[5], (E,), jnp.float32) * 0.1
    fc_weight = jax.random.normal(keys[6], (O, E), jnp.float32) * 0.1
    fc_bias = jax.random.normal(keys[7], (O,), jnp.float32) * 0.1

    # One-time parameter folding / packing (outside the per-call hot path).
    params_blob, layout = prepare_params(inducing_points, in_proj_weight, in_proj_bias,
                                         out_proj_weight, out_proj_bias, fc_weight, fc_bias,
                                         num_heads=H)
    params_blob = jax.block_until_ready(params_blob)

    # Batched path (parallel grid axis over sets).
    out_b = jax.block_until_ready(
        set_transformer_forward_batched(xb, params_blob, layout=layout))
    # Module-equivalent unbatched path (B=1 special case).
    out_0 = jax.block_until_ready(
        set_transformer_forward(xb[0], params_blob, layout=layout))

    ref_b = np.stack([np.asarray(reference_forward(
        xb[i], inducing_points, in_proj_weight, in_proj_bias,
        out_proj_weight, out_proj_bias, fc_weight, fc_bias, num_heads=H))
        for i in range(B)])

    np.testing.assert_allclose(np.asarray(out_b), ref_b, rtol=1e-4, atol=2e-5)
    np.testing.assert_allclose(np.asarray(out_0), ref_b[0], rtol=1e-4, atol=2e-5)
    print("KERNEL_OK")
</pallas_src>

<mosaic_0001>
module attributes {stable_mosaic.version = 11 : i64} {
  func.func @set_transformer_kernel(%arg0: i32, %arg1: memref<152x32xf32, #tpu.memory_space<vmem>>, %arg2: memref<1x16x32xf32, #tpu.memory_space<vmem>>, %arg3: memref<1x1x8xf32, #tpu.memory_space<vmem>>) attributes {dimension_semantics = [#tpu.dimension_semantics<parallel>], iteration_bounds = array<i64: 4>, scalar_prefetch = 0 : i64, scratch_operands = 0 : i64, tpu.core_type = #tpu.core_type<tc>, window_params = [{pipeline_mode = #tpu.pipeline_mode<synchronous>, transform_indices = @transform_0, window_bounds = array<i64: 152, 32>}, {transform_indices = @transform_1, window_bounds = array<i64: 1, 16, 32>}, {transform_indices = @transform_2, window_bounds = array<i64: 1, 1, 8>}]} {
    %c0 = arith.constant 0 : index
    %c0_0 = arith.constant 0 : index
    %0 = vector.load %arg1[%c0, %c0_0] : memref<152x32xf32, #tpu.memory_space<vmem>>, vector<32x32xf32>
    %c32 = arith.constant 32 : index
    %c0_1 = arith.constant 0 : index
    %1 = vector.load %arg1[%c32, %c0_1] : memref<152x32xf32, #tpu.memory_space<vmem>>, vector<32x32xf32>
    %c64 = arith.constant 64 : index
    %c0_2 = arith.constant 0 : index
    %2 = vector.load %arg1[%c64, %c0_2] : memref<152x32xf32, #tpu.memory_space<vmem>>, vector<32x32xf32>
    %c96 = arith.constant 96 : index
    %c0_3 = arith.constant 0 : index
    %3 = vector.load %arg1[%c96, %c0_3] : memref<152x32xf32, #tpu.memory_space<vmem>>, vector<1x32xf32>
    %c104 = arith.constant 104 : index
    %c0_4 = arith.constant 0 : index
    %4 = vector.load %arg1[%c104, %c0_4] : memref<152x32xf32, #tpu.memory_space<vmem>>, vector<1x32xf32>
    %c112 = arith.constant 112 : index
    %c0_5 = arith.constant 0 : index
    %5 = vector.load %arg1[%c112, %c0_5] : memref<152x32xf32, #tpu.memory_space<vmem>>, vector<32x8xf32>
    %c144 = arith.constant 144 : index
    %c0_6 = arith.constant 0 : index
    %6 = vector.load %arg1[%c144, %c0_6] : memref<152x32xf32, #tpu.memory_space<vmem>>, vector<1x8xf32>
    %c0_7 = arith.constant 0 : index
    %c0_8 = arith.constant 0 : index
    %c0_9 = arith.constant 0 : index
    %7 = vector.load %arg2[%c0_7, %c0_8, %c0_9] : memref<1x16x32xf32, #tpu.memory_space<vmem>>, vector<1x16x32xf32>
    %8 = vector.shape_cast %7 : vector<1x16x32xf32> to vector<16x32xf32>
    %cst = arith.constant dense<0.000000e+00> : vector<32x16xf32>
    %9 = tpu.matmul %0, %8, %cst {dimension_numbers = #tpu.dot_dimension_numbers<[1], [1], [0], [0], [0, 0, 1, 0], [], []>} : vector<32x32xf32>, vector<16x32xf32>, vector<32x16xf32> -> vector<32x16xf32>
    %cst_10 = arith.constant dense<0xFF800000> : vector<32xf32>
    %10 = vector.multi_reduction <maximumf>, %9, %cst_10 [1] : vector<32x16xf32> to vector<32xf32>
    %11 = vector.shape_cast %10 : vector<32xf32> to vector<32x1xf32>
    %12 = vector.broadcast %11 : vector<32x1xf32> to vector<32x16xf32>
    %13 = arith.subf %9, %12 : vector<32x16xf32>
    %14 = math.exp %13 : vector<32x16xf32>
    %cst_11 = arith.constant dense<0.000000e+00> : vector<32xf32>
    %15 = vector.multi_reduction <add>, %14, %cst_11 [1] : vector<32x16xf32> to vector<32xf32>
    %16 = vector.shape_cast %15 : vector<32xf32> to vector<32x1xf32>
    %17 = tpu.reciprocal %16 : vector<32x1xf32> -> vector<32x1xf32>
    %18 = vector.broadcast %17 : vector<32x1xf32> to vector<32x16xf32>
    %19 = arith.mulf %14, %18 : vector<32x16xf32>
    %cst_12 = arith.constant dense<0.000000e+00> : vector<16x32xf32>
    %20 = tpu.matmul %8, %2, %cst_12 {dimension_numbers = #tpu.dot_dimension_numbers<[1], [0], [0], [1], [0, 0, 1, 1], [], []>} : vector<16x32xf32>, vector<32x32xf32>, vector<16x32xf32> -> vector<16x32xf32>
    %21 = vector.broadcast %3 : vector<1x32xf32> to vector<16x32xf32>
    %22 = arith.addf %20, %21 : vector<16x32xf32>
    %cst_13 = arith.constant dense<0.000000e+00> : vector<32x32xf32>
    %23 = tpu.matmul %19, %22, %cst_13 {dimension_numbers = #tpu.dot_dimension_numbers<[1], [0], [0], [1], [0, 0, 1, 1], [], []>} : vector<32x16xf32>, vector<16x32xf32>, vector<32x32xf32> -> vector<32x32xf32>
    %24 = arith.mulf %23, %1 : vector<32x32xf32>
    %cst_14 = arith.constant dense<0.000000e+00> : vector<1x32xf32>
    %25 = tpu.matmul %4, %24, %cst_14 {dimension_numbers = #tpu.dot_dimension_numbers<[1], [0], [0], [1], [0, 0, 1, 1], [], []>} : vector<1x32xf32>, vector<32x32xf32>, vector<1x32xf32> -> vector<1x32xf32>
    %cst_15 = arith.constant dense<0.000000e+00> : vector<1x8xf32>
    %26 = tpu.matmul %25, %5, %cst_15 {dimension_numbers = #tpu.dot_dimension_numbers<[1], [0], [0], [1], [0, 0, 1, 1], [], []>} : vector<1x32xf32>, vector<32x8xf32>, vector<1x8xf32> -> vector<1x8xf32>
    %27 = arith.addf %26, %6 : vector<1x8xf32>
    %c0_16 = arith.constant 0 : index
    %c0_17 = arith.constant 0 : index
    %c0_18 = arith.constant 0 : index
    %28 = vector.load %arg3[%c0_16, %c0_17, %c0_18] : memref<1x1x8xf32, #tpu.memory_space<vmem>>, vector<1x1x8xf32>
    %29 = vector.shape_cast %28 : vector<1x1x8xf32> to vector<1x8xf32>
    %30 = vector.shape_cast %27 : vector<1x8xf32> to vector<1x1x8xf32>
    tpu.vector_store %arg3[%c0_16, %c0_17, %c0_18], %30 {strides = array<i32>} : memref<1x1x8xf32, #tpu.memory_space<vmem>>, vector<1x1x8xf32>,
    return
  }
  func.func @transform_0(%arg0: i32) -> (i32, i32) {
    %c0_i32 = arith.constant 0 : i32
    %c0_i32_0 = arith.constant 0 : i32
    %c0_i32_1 = arith.constant 0 : i32
    return %c0_i32, %c0_i32_0 : i32, i32
  }
  func.func @transform_1(%arg0: i32) -> (i32, i32, i32) {
    %c0_i32 = arith.constant 0 : i32
    %c0_i32_0 = arith.constant 0 : i32
    %c0_i32_1 = arith.constant 0 : i32
    return %arg0, %c0_i32, %c0_i32_0 : i32, i32, i32
  }
  func.func @transform_2(%arg0: i32) -> (i32, i32, i32) {
    %c0_i32 = arith.constant 0 : i32
    %c0_i32_0 = arith.constant 0 : i32
    %c0_i32_1 = arith.constant 0 : i32
    return %arg0, %c0_i32, %c0_i32_0 : i32, i32, i32
  }
}

</mosaic_0001>

<bundles_post_ra>
// kernel: tpu_custom_call.1
= control target key start
LH: loop header
LB: loop body
LE: loop exit
PB: predicated region body
PF: predicated region fallthrough
CT: control target
= control target key end

     0   :  { %7 = vsyncpa [#allocation3], 0  ;;  %s830_s0 = inlined_call_operand.vmem [shape: f32[152,32], index: 0, kind: input, shape index: {}]   ;;  %s831_s1 = inlined_call_operand.vmem [shape: f32[4,16,32], index: 1, kind: input, shape index: {}]   ;;  %s832_s2 = inlined_call_operand.hbm [shape: f32[4,1,8], index: 2, kind: output, shape index: {}]  }
   0x1   :  { %9 = vsyncpa [#allocation3 + $0x1], 0  ;;  %s652_s9 = smov 0   ;;  %s654_s10 = smov 0  }
   0x2   :  { %s656_s11 = smov 0   ;;  %s658_s12 = smov 0  }
   0x3 LB: > { %s673_s13 = sadd.s32 4294967295, %s635_s12   ;;  %s492_s14 = sadd.s32 4294967294, %s635_s12   ;;  %s635_s12 = sphi %s658_s12, %s838_s12   ;;  %s631_s11 = sphi %s656_s11, %s837_s11   ;;  %s627_s10 = sphi %s654_s10, %s836_s10   ;;  %s623_s9 = sphi %s652_s9, %s835_s9  }
   0x4   : > { %s677_s15 = sadd.s32 1, %s635_s12   ;;  %s69_s16 = sadd.s32 1, %s631_s11 }
   0x5   : > { %s66_s17 = ssub.s32 %s635_s12, %s677_s15  ;;  %p79_p0 = scmp.ne.s32.totalorder %s631_s11, %s627_s10 }
   0x6   : > { %p67_p1 = scmp.eq.s32.totalorder %s66_s17, 0  ;;  %p80_p2 = scmp.eq.s32.totalorder %s673_s13, 3 }
   0x7   : > { %p85_p3 = scmp.ne.s32.totalorder %s627_s10, %s623_s9  ;;  %p86_p4 = scmp.eq.s32.totalorder %s492_s14, 3 }
   0x8   : > { %s688_s18 = scalar_select %p67_p1, %s631_s11, %s69_s16  }
   0x9   : > { %p690_p5 = por %p80_p2, %p79_p0  ;;  %p694_p6 = por %p86_p4, %p85_p3 }
   0xa   : > { %p495_p7 = scmp.ge.s32.totalorder %s635_s12, 1  ;;  %p115_p8 = scmp.lt.s32.totalorder %s635_s12, 5 }
   0xc   : > { %p116_p9 = pnand %p495_p7, %p115_p8 }
   0xd   : > { %p136_p10 = scmp.lt.s32.totalorder (!%p116_p9), %s673_s13, 3  ;;  %s134_s24 = sand.u32 (!%p116_p9), 1, %s627_s10  }
   0xe   : > { %119 = sbr.rel (%p116_p9) target bundleno = 855 (0x357), region = 28  ;;  %s433_s27 = scalar_lea.hbm (!%p116_p9), %s832_s2, %s673_s13 }
   0xf   : > { %s135_s30 = scalar_lea.vmem (!%p116_p9), [#allocation2], %s134_s24  ;;  %s437_s4 = sshll.u32 (!%p116_p9), %s433_s27, 4  ;;  %s438_s4 = int_to_ptr.hbm [resolvable:$true] %s437_s4 }
  0x10   : > { %s435_s3 = sshll.u32 (!%p116_p9), %s135_s30, 4  ;;  %s425_s5 = scalar_lea.sflag (!%p116_p9), [#allocation3], %s134_s24  ;;  %s436_s3 = int_to_ptr.vmem [resolvable:$true] %s435_s3 }
  0x11   : > { %s587_s6 = sshra.s32 (!%p116_p9), %s438_s4, 4  ;;  %s593_s14 = scalar_lea.hbm (!%p116_p9), %s832_s2, 4  ;;  %s588_s6 = int_to_ptr.hbm [resolvable:$true] %s587_s6 }
  0x12   : > { %s589_s7 = scalar_lea.hbm (!%p116_p9), %s588_s6, 1  ;;  %p594_p0 = scmp.lt.s32.totalorder (!%p116_p9), %s588_s6, %s832_s2 }
  0x13   : > { %s137_s21 = scalar_select %p136_p10, %s673_s13, 3  ;;  %vm162_vm0 = vcmask 261120   ;;  %v141_v2 = vld [vmem:[%s830_s0] sm:$0xff]  ;;  %v144_v3 = vld [vmem:[%s830_s0 + $0x18] sm:$0xff]  ;;  %v142_v4 = vld [vmem:[%s830_s0 + $0x8] sm:$0xff]  ;;  %vm210_vm1 = vcmask 130048  }
  0x14   : > { %v143_v5 = vld [vmem:[%s830_s0 + $0x10] sm:$0xff]  ;;  %v152_v6 = vld [vmem:[%s830_s0 + $0x58] sm:$0xff]  ;;  %v150_v8 = vld [vmem:[%s830_s0 + $0x48] sm:$0xff]  ;;  %p590_p11 = scmp.ne.s32.totalorder %s588_s6, %s589_s7  ;;  %p595_p1 = scmp.lt.s32.totalorder %s593_s14, %s589_s7 }
  0x15   : > { %s514_s22 = sshll.u32 %s137_s21, 4  ;;  %v151_v7 = vld [vmem:[%s830_s0 + $0x50] sm:$0xff]  ;;  %v149_v9 = vld [vmem:[%s830_s0 + $0x40] sm:$0xff] }
  0x16   : > { %s140_s25 = scalar_lea.vmem %s831_s1, %s514_s22  ;;  %v556_v39 = vld [vmem:[%s830_s0 + $0x60] ss:$0 sm:$0xff]  ;;  %p591_p12 = pnand %p590_p11, %p690_p5 }
  0x17   : > { %v161_v0 = vld [vmem:[%s140_s25 + $0x8] sm:$0xff]  ;;  %v160_v1 = vld [vmem:[%s140_s25] sm:$0xff]  ;;  %p596_p2 = por %p595_p1, %p594_p0 }
  0x18   : > { %498 = vmatpush.xpose.msk.msra.mxu0 %vm162_vm0, %v161_v0  ;;  %515 = vmatpush.xpose.msk.msra.mxu1 %vm162_vm0, %v161_v0  ;;  %p592_p13 = pneg %p591_p12 }
  0x1a   : > { %p597_p3 = pnand %p596_p2, %p592_p13 }
  0x1c   : > { %499 = vmatpush.xpose.msk.msra.mxu0 %vm162_vm0, %v160_v1  ;;  %516 = vmatpush.xpose.msk.msra.mxu1 %vm162_vm0, %v160_v1 }
  0x1f   : > { %500 = vmatmul.msk.f32.vlgmr.msra.gmra.mxu0 %vm162_vm0, %v141_v2  ;;  %503 = vmatmul.msk.f32.vlgmr.msra.gmra.mxu1 %vm162_vm0, %v144_v3 }
  0x20   : > { %320 = vmatpush.msrb.mxu1 %v152_v6 }
  0x22   : > { %321 = vmatpush.msrb.mxu1 %v151_v7 }
  0x24   : > { %322 = vmatpush.msrb.mxu1 %v150_v8 }
  0x26   : > { %323 = vmatpush.msrb.mxu1 %v149_v9 }
  0x27   : > { %501 = vmatmul.msk.f32.gmra.mxu0 %vm162_vm0, %v142_v4  ;;  %504 = vmatmul.msk.f32.vlgmr.msrb.gmra.mxu1 %vm162_vm0, %v160_v1 }
  0x2f   : > { %502 = vmatmul.msk.f32.gmra.mxu0 %vm162_vm0, %v143_v5  ;;  %505 = vmatmul.msk.f32.gmra.mxu1 %vm162_vm0, %v161_v0 }
  0x9c   : > { %v198_v10 = vpop.f32.mrf.mxu0  ;;  %v207_v16 = vpop.f32.mrf.mxu1 }
  0x9d   : > { %v211_v11 = vsel %vm210_vm1, %v198_v10, -inf  ;;  %v220_v17 = vsel %vm210_vm1, %v207_v16, -inf }
  0x9e   : > { %212 = vmax.xlane.f32.xlu0 %v211_v11 }
  0xa4   : > { %v201_v12 = vpop.f32.mrf.mxu0  ;;  %v325_v38 = vpop.f32.mrf.mxu1 }
  0xa5   : > { %v214_v13 = vsel %vm210_vm1, %v201_v12, -inf  ;;  %v326_v41 = vadd.f32 %v556_v39, %v325_v38 }
  0xa6   : > { %215 = vmax.xlane.f32.xlu0 %v214_v13 }
  0xac   : > { %v204_v14 = vpop.f32.mrf.mxu0  ;;  %v328_v40 = vpop.f32.mrf.mxu1 }
  0xad   : > { %v217_v15 = vsel %vm210_vm1, %v204_v14, -inf  ;;  %v329_v42 = vadd.f32 %v556_v39, %v328_v40  ;;  %v154_v39 = vld [vmem:[%s830_s0 + $0x68] sm:$0x1] }
  0xae   : > { %218 = vmax.xlane.f32.xlu1 %v217_v15  ;;  %v158_v40 = vld [vmem:[%s830_s0 + $0x88] sm:$0xff] }
  0xaf   : > { %357 = vmatpush.msra.mxu2 %v329_v42  ;;  %v156_v42 = vld [vmem:[%s830_s0 + $0x78] sm:$0xff] }
  0xb1   : > { %358 = vmatpush.msra.mxu2 %v326_v41  ;;  %v157_v41 = vld [vmem:[%s830_s0 + $0x80] sm:$0xff] }
  0xb6   : > { %221 = vmax.xlane.f32.xlu1 %v220_v17 }
 0x111   : > { %v213_v18 = vpop.xlane.xlu0 %212 }
 0x112   : > { %v223_v19 = vsub.f32 %v198_v10, %v213_v18 }
 0x114   : > { %v227_v20 = vmul.f32 1.442695, %v223_v19 }
 0x116   : > { %557 = vpow2.f32 %v227_v20 }
 0x119   : > { %v216_v21 = vpop.xlane.xlu0 %215 }
 0x11a   : > { %v224_v22 = vsub.f32 %v201_v12, %v216_v21 }
 0x11c   : > { %v558_v23 = vpop.eup %557  ;;  %v229_v24 = vmul.f32 1.442695, %v224_v22 }
 0x11d   : > { %v235_v25 = vsel %vm210_vm1, %v558_v23, 0.0 }
 0x11e   : > { %559 = vpow2.f32 %v229_v24  ;;  %236 = vadd.xlane.f32.xlu2 %v235_v25 }
 0x121   : > { %v219_v26 = vpop.xlane.xlu1 %218 }
 0x122   : > { %v225_v27 = vsub.f32 %v204_v14, %v219_v26 }
 0x124   : > { %v744_v28 = vpop.eup %559  ;;  %v231_v29 = vmul.f32 1.442695, %v225_v27 }
 0x125   : > { %v238_v30 = vsel %vm210_vm1, %v744_v28, 0.0 }
 0x126   : > { %561 = vpow2.f32 %v231_v29  ;;  %239 = vadd.xlane.f32.xlu2 %v238_v30  ;;  %v148_v30 = vld [vmem:[%s830_s0 + $0x38] sm:$0xff] }
 0x129   : > { %v222_v31 = vpop.xlane.xlu1 %221 }
 0x12a   : > { %v226_v32 = vsub.f32 %v207_v16, %v222_v31  ;;  %v147_v31 = vld [vmem:[%s830_s0 + $0x30] sm:$0xff] }
 0x12c   : > { %v748_v33 = vpop.eup %561  ;;  %v233_v34 = vmul.f32 1.442695, %v226_v32 }
 0x12d   : > { %v241_v35 = vsel %vm210_vm1, %v748_v33, 0.0 }
 0x12e   : > { %563 = vpow2.f32 %v233_v34  ;;  %242 = vadd.xlane.f32.xlu0 %v241_v35  ;;  %v146_v34 = vld [vmem:[%s830_s0 + $0x28] sm:$0xff] }
 0x134   : > { %v752_v36 = vpop.eup %563 }
 0x135   : > { %v244_v37 = vsel %vm210_vm1, %v752_v36, 0.0 }
 0x136   : > { %245 = vadd.xlane.f32.xlu1 %v244_v37 }
 0x191   : > { %v237_v43 = vpop.xlane.xlu2 %236 }
 0x192   : > { %565 = vrcp.f32 %v237_v43  ;;  %v258_v49 = vand.u32 2147483648, %v237_v43  ;;  %v256_v50 = vand.u32 2147483647, %v237_v43  ;;  %vm252_vm3 = vweird.f32 %v237_v43 }
 0x194   : > { %v259_v53 = vor.u32 1.1754944e-38, %v258_v49  ;;  %vm257_vm5 = vcmp.eq.f32.partialorder %v256_v50, 8.507059e+37 }
 0x198   : > { %v566_v44 = vpop.eup %565 }
 0x199   : > { %v248_v45 = vmul.f32 %v566_v44, %v237_v43  ;;  %v240_v46 = vpop.xlane.xlu2 %239  ;;  %vm253_vm2 = vweird.f32 %v566_v44  ;;  %v155_v43 = vld [vmem:[%s830_s0 + $0x70] sm:$0xff] }
 0x19a   : > { %567 = vrcp.f32 %v240_v46  ;;  %vm254_vm4 = vmor %vm252_vm3, %vm253_vm2  ;;  %v272_v61 = vand.u32 2147483648, %v240_v46  ;;  %v270_v62 = vand.u32 2147483647, %v240_v46  ;;  %vm266_vm7 = vweird.f32 %v240_v46 }
 0x19b   : > { %v249_v47 = vsub.f32 1.0, %v248_v45  ;;  %v159_v45 = vld [vmem:[%s830_s0 + $0x90] sm:$0x1] }
 0x19c   : > { %v273_v1 = vor.u32 1.1754944e-38, %v272_v61  ;;  %vm271_vm9 = vcmp.eq.f32.partialorder %v270_v62, 8.507059e+37 }
 0x19d   : > { %v250_v48 = vmul.f32 %v566_v44, %v249_v47 }
 0x19f   : > { %v251_v51 = vadd.f32 %v566_v44, %v250_v48 }
 0x1a0   : > { %v568_v52 = vpop.eup %567 }
 0x1a1   : > { %v262_v54 = vmul.f32 %v568_v52, %v240_v46  ;;  %v243_v55 = vpop.xlane.xlu0 %242  ;;  %v255_v56 = vsel %vm254_vm4, %v566_v44, %v251_v51  ;;  %vm267_vm6 = vweird.f32 %v568_v52 }
 0x1a2   : > { %569 = vrcp.f32 %v243_v55  ;;  %v260_v58 = vsel %vm257_vm5, %v259_v53, %v255_v56  ;;  %vm268_vm8 = vmor %vm266_vm7, %vm267_vm6  ;;  %v286_v7 = vand.u32 2147483648, %v243_v55  ;;  %v284_v10 = vand.u32 2147483647, %v243_v55 }
 0x1a3   : > { %v263_v57 = vsub.f32 1.0, %v262_v54  ;;  %v303_v59 = vmul.f32 %v558_v23, %v260_v58  ;;  %vm280_vm11 = vweird.f32 %v243_v55 }
 0x1a4   : > { %v287_v13 = vor.u32 1.1754944e-38, %v286_v7  ;;  %vm285_vm13 = vcmp.eq.f32.partialorder %v284_v10, 8.507059e+37 }
 0x1a5   : > { %v264_v60 = vmul.f32 %v568_v52, %v263_v57  ;;  %506 = vmatmul.msk.f32.vlgmr.msra.gmra.mxu2 %vm210_vm1, %v303_v59 }
 0x1a7   : > { %v265_v63 = vadd.f32 %v568_v52, %v264_v60 }
 0x1a8   : > { %v570_v0 = vpop.eup %569 }
 0x1a9   : > { %v276_v2 = vmul.f32 %v570_v0, %v243_v55  ;;  %v246_v3 = vpop.xlane.xlu1 %245  ;;  %v269_v4 = vsel %vm268_vm8, %v568_v52, %v265_v63  ;;  %vm281_vm10 = vweird.f32 %v570_v0 }
 0x1aa   : > { %571 = vrcp.f32 %v246_v3  ;;  %v274_v6 = vsel %vm271_vm9, %v273_v1, %v269_v4  ;;  %vm282_vm12 = vmor %vm280_vm11, %vm281_vm10  ;;  %v300_v19 = vand.u32 2147483648, %v246_v3  ;;  %v298_v21 = vand.u32 2147483647, %v246_v3 }
 0x1ab   : > { %v277_v5 = vsub.f32 1.0, %v276_v2  ;;  %v304_v8 = vmul.f32 %v744_v28, %v274_v6  ;;  %vm294_vm15 = vweird.f32 %v246_v3 }
 0x1ac   : > { %v301_v23 = vor.u32 1.1754944e-38, %v300_v19  ;;  %vm299_vm3 = vcmp.eq.f32.partialorder %v298_v21, 8.507059e+37 }
 0x1ad   : > { %v278_v9 = vmul.f32 %v570_v0, %v277_v5  ;;  %507 = vmatmul.msk.f32.gmra.mxu2 %vm210_vm1, %v304_v8 }
 0x1af   : > { %v279_v11 = vadd.f32 %v570_v0, %v278_v9 }
 0x1b0   : > { %v572_v12 = vpop.eup %571 }
 0x1b1   : > { %v290_v14 = vmul.f32 %v572_v12, %v246_v3  ;;  %v283_v15 = vsel %vm282_vm12, %v570_v0, %v279_v11  ;;  %vm295_vm14 = vweird.f32 %v572_v12 }
 0x1b2   : > { %v288_v16 = vsel %vm285_vm13, %v287_v13, %v283_v15  ;;  %vm296_vm2 = vmor %vm294_vm15, %vm295_vm14 }
 0x1b3   : > { %v291_v17 = vsub.f32 1.0, %v290_v14  ;;  %v305_v18 = vmul.f32 %v748_v33, %v288_v16 }
 0x1b5   : > { %v292_v20 = vmul.f32 %v572_v12, %v291_v17  ;;  %508 = vmatmul.msk.f32.gmra.mxu2 %vm210_vm1, %v305_v18 }
 0x1b7   : > { %v293_v22 = vadd.f32 %v572_v12, %v292_v20 }
 0x1b9   : > { %v297_v24 = vsel %vm296_vm2, %v572_v12, %v293_v22 }
 0x1ba   : > { %v302_v25 = vsel %vm299_vm3, %v301_v23, %v297_v24 }
 0x1bb   : > { %v306_v26 = vmul.f32 %v752_v36, %v302_v25  ;;  %v145_v36 = vld [vmem:[%s830_s0 + $0x20] sm:$0xff] }
 0x1bd   : > { %509 = vmatmul.msk.f32.gmra.mxu2 %vm210_vm1, %v306_v26  ;;  %vm422_vm1 = vcmask 57344  }
 0x228   : > { %v360_v27 = vpop.f32.mrf.mxu2 }
 0x229   : > { %v372_v38 = vmul.f32 %v360_v27, %v145_v36 }
 0x230   : > { %v363_v28 = vpop.f32.mrf.mxu2 }
 0x231   : > { %v373_v37 = vmul.f32 %v363_v28, %v146_v34 }
 0x238   : > { %v366_v29 = vpop.f32.mrf.mxu2 }
 0x239   : > { %v374_v35 = vmul.f32 %v366_v29, %v147_v31 }
 0x240   : > { %v369_v32 = vpop.f32.mrf.mxu2 }
 0x241   : > { %v375_v33 = vmul.f32 %v369_v32, %v148_v30 }
 0x243   : > { %391 = vmatpush.msra.mxu3 %v375_v33 }
 0x245   : > { %392 = vmatpush.msra.mxu3 %v374_v35 }
 0x247   : > { %393 = vmatpush.msra.mxu3 %v373_v37 }
 0x249   : > { %394 = vmatpush.msra.mxu3 %v372_v38 }
 0x24a   : > { %510 = vmatmul.msk.f32.vlgmr.msra.gmra.mxu3 %vm162_vm0, %v154_v39 }
 0x24b   : > { %414 = vmatpush.msrb.mxu3 %v158_v40 }
 0x24d   : > { %415 = vmatpush.msrb.mxu3 %v157_v41 }
 0x24f   : > { %416 = vmatpush.msrb.mxu3 %v156_v42 }
 0x251   : > { %417 = vmatpush.msrb.mxu3 %v155_v43 }
 0x2cd   : > { %v396_v44 = vpop.f32.mrf.mxu3 }
 0x2ce   : > { %511 = vmatmul.msk.f32.vlgmr.msrb.gmra.mxu3 %vm162_vm0, %v396_v44 }
 0x351   : > { %v419_v46 = vpop.f32.mrf.mxu3 }
 0x352   : > { %v420_v47 = vadd.f32 %v419_v46, %v159_v45 }
 0x354   : > { %423 = vst.msk [vmem:[%s135_s30] sm:$0x1] %vm422_vm1, %v420_v47 }
 0x355   : > { %600 = shalt.err (!%p597_p3)
}
 0x356   : > { %517 = dma.vmem_to_hbm [thread:$0]  (%p690_p5), %s436_s3, 16, %s438_s4, %s425_s5  }
 0x357 PF: > { %p523_p4 = scmp.ge.s32.totalorder %s635_s12, 2  ;;  %s449_s21 = sand.u32 1, %s623_s9  }
 0x358   : > { %s450_s22 = scalar_lea.sflag [#allocation3], %s449_s21 }
 0x359   : > { %p520_p7 = pnand %p523_p4, %p694_p6 }
 0x35b   : > { %p521_p8 = pneg %p520_p7 }
 0x35d   : > { %618 = dma.done.wait (%p521_p8), %s450_s22, 16  }
 0x35e   : > { %620 = vsyncadd (%p521_p8), %s450_s22, 4294967280  ;;  %p12_p9 = scmp.ge.s32.totalorder %s677_s15, 6   ;;  %s835_s9 = smov %s627_s10 }
 0x35f   : > { %s836_s10 = smov %s631_s11  ;;  %s837_s11 = smov %s688_s18 }
 0x360   : > { %s838_s12 = smov %s677_s15  ;;  %14 = sbr.rel (!%p12_p9) target bundleno = 3 (0x3), region = 63 }
 0x365   :  { %455 = vsyncpa [#allocation3], 1 }
 0x366   :  { %457 = vsyncpa [#allocation3 + $0x1], 1 }

</bundles_post_ra>
